<compile_context>
chip_gen: v6e
topology: v6e:2x2x1
jax: 0.10.0
libtpu: 0.0.40
codegen_flags: <defaults>
</compile_context>

<pallas_src>
import jax
import jax.numpy as jnp
from jax.experimental import pallas as pl
from jax.experimental.pallas import tpu as pltpu


def _round_up(n: int, m: int) -> int:
    return ((n + m - 1) // m) * m


def rieszarch_kernel(x_ref, w1_ref, b1_ref, w2_ref, b2_ref, o_ref):
    # Layer 1: MXU matmul (f32 accumulation) + VPU bias / ReLU.
    h = jnp.dot(x_ref[...], w1_ref[...], preferred_element_type=jnp.float32)
    h = jnp.maximum(h + b1_ref[...], 0.0)
    # Layer 2 (riesz head already folded into w2/b2): f32 dot, dense store.
    out = jnp.dot(h, w2_ref[...], preferred_element_type=jnp.float32)
    o_ref[...] = (out + b2_ref[...]).astype(o_ref.dtype)


def riesz_arch(x, w1, b1, w2, b2, beta, *, tb=None,
               vmem_budget_bytes=20 << 20):
    """RieszArch forward.

    x: [B, F]; w1: [F, H]; b1: [1, H]; w2: [H, n_out]; b2: [1, n_out];
    beta: [1].  Returns [B, n_out + 1] float32.
    `tb` (optional) = batch rows per grid step (auto-sized from VMEM if None).
    """
    B, F = x.shape
    H, n_out = w2.shape
    n_aug = n_out + 1
    f32 = jnp.float32

    # ---- fold the riesz head into the second layer (one-time O(H) op) ------
    # srr = out[:,0] + beta*out[:,1]
    #     = h @ (w2[:,0] + beta*w2[:,1]) + (b2[:,0] + beta*b2[:,1])
    beta_s = beta.reshape(()).astype(f32)
    w2f, b2f = w2.astype(f32), b2.astype(f32)
    w2_aug = jnp.concatenate([w2f, w2f[:, 0:1] + beta_s * w2f[:, 1:2]], axis=1)
    b2_aug = jnp.concatenate([b2f, b2f[:, 0:1] + beta_s * b2f[:, 1:2]], axis=1)

    # ---- fold R batch rows into the lane dimension --------------------------
    # x (B,F) -> (B/R, R*F) is a free contiguous reshape; block-diagonal
    # weights keep the math identical.  Makes x/h lane-dense and feeds
    # full-depth MXU passes; extra flops on the zero blocks are free
    # (kernel is HBM-bound, not MXU-bound).
    fold = 1
    for r in (8, 4, 2):
        if B % r == 0 and r * F <= 256 and r * H <= 512:
            fold = r
            break

    RF, RH, RN = fold * F, fold * H, fold * n_aug
    eye = jnp.eye(fold, dtype=f32)
    w1_big = jnp.kron(eye, w1.astype(f32)).astype(x.dtype)   # [RF, RH]
    b1_big = jnp.tile(b1.astype(f32), (1, fold))             # [1, RH]
    w2_big = jnp.kron(eye, w2_aug)                           # [RH, RN] (f32)
    b2_big = jnp.tile(b2_aug, (1, fold))                     # [1, RN]

    Bf = B // fold
    xf = x.reshape(Bf, RF)

    # ---- batch tile size: sized by VMEM budget, ragged last block -----------
    itemsize = jnp.dtype(x.dtype).itemsize
    lane = 128
    rf_pad = _round_up(RF, lane)
    rh_pad = _round_up(RH, lane)
    rn_pad = _round_up(RN, lane)
    # 2x-buffered x block + 2x-buffered out block + h / out intermediates.
    bytes_per_row = (2 * rf_pad * itemsize + 2 * rn_pad * 4
                     + (rh_pad + rn_pad) * 4)
    if tb is None:
        tbf = max(8, (vmem_budget_bytes // bytes_per_row) // 8 * 8)
    else:
        tbf = max(8, _round_up(max(1, tb // fold), 8))
    tbf = min(tbf, _round_up(Bf, 8))

    # If a single tile would cover everything but there is enough work for two
    # >= ~1 MiB x blocks, split so the "parallel" batch axis can use both
    # TensorCores on v7x.
    if tb is None:
        min_split_rows = max(8, (1 << 20) // (rf_pad * itemsize))
        if tbf >= Bf and Bf >= 2 * min_split_rows:
            tbf = _round_up(pl.cdiv(Bf, 2), 8)

    grid = (pl.cdiv(Bf, tbf),)

    weight_bytes = (w1_big.size * jnp.dtype(w1_big.dtype).itemsize
                    + (w2_big.size + b1_big.size + b2_big.size) * 4)
    cost = pl.CostEstimate(
        flops=2 * Bf * (RF * RH + RH * RN),
        transcendentals=0,
        bytes_accessed=Bf * RF * itemsize + Bf * RN * 4 + weight_bytes,
    )

    out = pl.pallas_call(
        rieszarch_kernel,
        out_shape=jax.ShapeDtypeStruct((Bf, RN), jnp.float32),
        grid=grid,
        in_specs=[
            # x streamed over the batch grid (auto double-buffered).
            pl.BlockSpec((tbf, RF), lambda i: (i, 0)),
            # weights/biases: constant index_map -> VMEM-resident across grid.
            pl.BlockSpec((RF, RH), lambda i: (0, 0)),
            pl.BlockSpec((1, RH), lambda i: (0, 0)),
            pl.BlockSpec((RH, RN), lambda i: (0, 0)),
            pl.BlockSpec((1, RN), lambda i: (0, 0)),
        ],
        out_specs=pl.BlockSpec((tbf, RN), lambda i: (i, 0)),
        compiler_params=pltpu.CompilerParams(
            dimension_semantics=("parallel",),
            vmem_limit_bytes=32 << 20,
        ),
        cost_estimate=cost,
    )(xf, w1_big, b1_big, w2_big, b2_big)

    # Free contiguous reshape back to (B, n_out + 1).
    return out.reshape(B, n_aug)


def _reference(x, w1, b1, w2, b2, beta):
    h = jnp.maximum(x @ w1 + b1, 0.0)
    out = h @ w2 + b2
    srr = out[:, 0:1] + beta.reshape(()) * out[:, 1:2]
    return jnp.concatenate([out, srr], axis=1)


if __name__ == "__main__":
    key = jax.random.PRNGKey(0)
    kx, k1, k2, k3, k4 = jax.random.split(key, 5)

    B, F, H, OUT = 8, 32, 32, 2  # learner must emit >= 2 outputs

    x = jax.random.normal(kx, (B, F), dtype=jnp.float32)
    w1 = jax.random.normal(k1, (F, H), dtype=jnp.float32) * 0.1
    b1 = jax.random.normal(k2, (1, H), dtype=jnp.float32) * 0.1
    w2 = jax.random.normal(k3, (H, OUT), dtype=jnp.float32) * 0.1
    b2 = jax.random.normal(k4, (1, OUT), dtype=jnp.float32) * 0.1
    beta = jnp.zeros((1,), dtype=jnp.float32)  # torch.zeros(1) init

    # 1) small case: 8-row lane fold, single (ragged) tile, beta = 0.
    y = riesz_arch(x, w1, b1, w2, b2, beta)
    jax.block_until_ready(y)
    ref = _reference(x, w1, b1, w2, b2, beta)
    assert y.shape == (B, OUT + 1)
    assert jnp.allclose(y, ref, atol=1e-5), "mismatch (folded, single tile)"

    # 2) odd batch (no fold), forced small tile -> multi-step ragged grid,
    #    nonzero beta.
    B2 = 19
    x2 = jax.random.normal(jax.random.PRNGKey(1), (B2, F), dtype=jnp.float32)
    beta2 = jnp.full((1,), 0.37, dtype=jnp.float32)
    y2 = riesz_arch(x2, w1, b1, w2, b2, beta2, tb=8)
    jax.block_until_ready(y2)
    ref2 = _reference(x2, w1, b1, w2, b2, beta2)
    assert y2.shape == (B2, OUT + 1)
    assert jnp.allclose(y2, ref2, atol=1e-5), "mismatch (no fold, ragged grid)"

    # 3) fold=4 + multi-step ragged grid (B=100 -> 25 folded rows, TB=8).
    B3 = 100
    x3 = jax.random.normal(jax.random.PRNGKey(2), (B3, F), dtype=jnp.float32)
    y3 = riesz_arch(x3, w1, b1, w2, b2, beta2, tb=32)
    jax.block_until_ready(y3)
    ref3 = _reference(x3, w1, b1, w2, b2, beta2)
    assert y3.shape == (B3, OUT + 1)
    assert jnp.allclose(y3, ref3, atol=1e-5), "mismatch (fold=4, ragged grid)"

    print("KERNEL_OK")
</pallas_src>

<mosaic_0001>
module attributes {stable_mosaic.version = 11 : i64} {
  func.func @rieszarch_kernel(%arg0: i32, %arg1: memref<8x256xf32, #tpu.memory_space<vmem>>, %arg2: memref<256x256xf32, #tpu.memory_space<vmem>>, %arg3: memref<1x256xf32, #tpu.memory_space<vmem>>, %arg4: memref<256x24xf32, #tpu.memory_space<vmem>>, %arg5: memref<1x24xf32, #tpu.memory_space<vmem>>, %arg6: memref<8x24xf32, #tpu.memory_space<vmem>>) attributes {dimension_semantics = [#tpu.dimension_semantics<parallel>], iteration_bounds = array<i64: 1>, scalar_prefetch = 0 : i64, scratch_operands = 0 : i64, tpu.core_type = #tpu.core_type<tc>, window_params = [{transform_indices = @transform_0, window_bounds = array<i64: 8, 256>}, {pipeline_mode = #tpu.pipeline_mode<synchronous>, transform_indices = @transform_1, window_bounds = array<i64: 256, 256>}, {pipeline_mode = #tpu.pipeline_mode<synchronous>, transform_indices = @transform_2, window_bounds = array<i64: 1, 256>}, {pipeline_mode = #tpu.pipeline_mode<synchronous>, transform_indices = @transform_3, window_bounds = array<i64: 256, 24>}, {pipeline_mode = #tpu.pipeline_mode<synchronous>, transform_indices = @transform_4, window_bounds = array<i64: 1, 24>}, {transform_indices = @transform_5, window_bounds = array<i64: 8, 24>}]} {
    %c0 = arith.constant 0 : index
    %c0_0 = arith.constant 0 : index
    %0 = vector.load %arg1[%c0, %c0_0] : memref<8x256xf32, #tpu.memory_space<vmem>>, vector<8x256xf32>
    %c0_1 = arith.constant 0 : index
    %c0_2 = arith.constant 0 : index
    %1 = vector.load %arg2[%c0_1, %c0_2] : memref<256x256xf32, #tpu.memory_space<vmem>>, vector<256x256xf32>
    %cst = arith.constant dense<0.000000e+00> : vector<8x256xf32>
    %2 = tpu.matmul %0, %1, %cst {dimension_numbers = #tpu.dot_dimension_numbers<[1], [0], [0], [1], [0, 0, 1, 1], [], []>} : vector<8x256xf32>, vector<256x256xf32>, vector<8x256xf32> -> vector<8x256xf32>
    %c0_3 = arith.constant 0 : index
    %c0_4 = arith.constant 0 : index
    %3 = vector.load %arg3[%c0_3, %c0_4] : memref<1x256xf32, #tpu.memory_space<vmem>>, vector<1x256xf32>
    %4 = vector.broadcast %3 : vector<1x256xf32> to vector<8x256xf32>
    %5 = arith.addf %2, %4 : vector<8x256xf32>
    %cst_5 = arith.constant 0.000000e+00 : f32
    %6 = vector.broadcast %cst_5 : f32 to vector<8x256xf32>
    %7 = arith.maximumf %5, %6 : vector<8x256xf32>
    %c0_6 = arith.constant 0 : index
    %c0_7 = arith.constant 0 : index
    %8 = vector.load %arg4[%c0_6, %c0_7] : memref<256x24xf32, #tpu.memory_space<vmem>>, vector<256x24xf32>
    %cst_8 = arith.constant dense<0.000000e+00> : vector<8x24xf32>
    %9 = tpu.matmul %7, %8, %cst_8 {dimension_numbers = #tpu.dot_dimension_numbers<[1], [0], [0], [1], [0, 0, 1, 1], [], []>} : vector<8x256xf32>, vector<256x24xf32>, vector<8x24xf32> -> vector<8x24xf32>
    %c0_9 = arith.constant 0 : index
    %c0_10 = arith.constant 0 : index
    %10 = vector.load %arg5[%c0_9, %c0_10] : memref<1x24xf32, #tpu.memory_space<vmem>>, vector<1x24xf32>
    %11 = vector.broadcast %10 : vector<1x24xf32> to vector<8x24xf32>
    %12 = arith.addf %9, %11 : vector<8x24xf32>
    %c0_11 = arith.constant 0 : index
    %c0_12 = arith.constant 0 : index
    %13 = vector.load %arg6[%c0_11, %c0_12] : memref<8x24xf32, #tpu.memory_space<vmem>>, vector<8x24xf32>
    tpu.vector_store %arg6[%c0_11, %c0_12], %12 {strides = array<i32>} : memref<8x24xf32, #tpu.memory_space<vmem>>, vector<8x24xf32>,
    return
  }
  func.func @transform_0(%arg0: i32) -> (i32, i32) {
    %c0_i32 = arith.constant 0 : i32
    %c0_i32_0 = arith.constant 0 : i32
    return %arg0, %c0_i32 : i32, i32
  }
  func.func @transform_1(%arg0: i32) -> (i32, i32) {
    %c0_i32 = arith.constant 0 : i32
    %c0_i32_0 = arith.constant 0 : i32
    %c0_i32_1 = arith.constant 0 : i32
    return %c0_i32, %c0_i32_0 : i32, i32
  }
  func.func @transform_2(%arg0: i32) -> (i32, i32) {
    %c0_i32 = arith.constant 0 : i32
    %c0_i32_0 = arith.constant 0 : i32
    %c0_i32_1 = arith.constant 0 : i32
    return %c0_i32, %c0_i32_0 : i32, i32
  }
  func.func @transform_3(%arg0: i32) -> (i32, i32) {
    %c0_i32 = arith.constant 0 : i32
    %c0_i32_0 = arith.constant 0 : i32
    %c0_i32_1 = arith.constant 0 : i32
    return %c0_i32, %c0_i32_0 : i32, i32
  }
  func.func @transform_4(%arg0: i32) -> (i32, i32) {
    %c0_i32 = arith.constant 0 : i32
    %c0_i32_0 = arith.constant 0 : i32
    %c0_i32_1 = arith.constant 0 : i32
    return %c0_i32, %c0_i32_0 : i32, i32
  }
  func.func @transform_5(%arg0: i32) -> (i32, i32) {
    %c0_i32 = arith.constant 0 : i32
    %c0_i32_0 = arith.constant 0 : i32
    return %arg0, %c0_i32 : i32, i32
  }
}

</mosaic_0001>

<bundles_post_ra>
// kernel: tpu_custom_call.1
= control target key start
LH: loop header
LB: loop body
LE: loop exit
PB: predicated region body
PF: predicated region fallthrough
CT: control target
= control target key end

     0   :  { %10 = vsyncpa [#allocation3], 0  ;;  %s684_s0 = inlined_call_operand.vmem [shape: f32[1,256], index: 0, kind: input, shape index: {}]   ;;  %s685_s1 = inlined_call_operand.hbm [shape: f32[256,256], index: 1, kind: input, shape index: {}]   ;;  %s686_s2 = inlined_call_operand.vmem [shape: f32[1,256], index: 2, kind: input, shape index: {}]   ;;  %s687_s3 = inlined_call_operand.vmem [shape: f32[256,24], index: 3, kind: input, shape index: {}]   ;;  %s688_s4 = inlined_call_operand.vmem [shape: f32[1,24], index: 4, kind: input, shape index: {}]   ;;  %s689_s5 = inlined_call_operand.hbm [shape: f32[1,24], index: 5, kind: output, shape index: {}]  }
   0x1   :  { %11 = vsyncpa [#allocation4], 0  ;;  %s482_s18 = smov [#allocation2]  }
   0x2   :  { %s19_s19 = sshll.u32 %s482_s18, 4  ;;  %s20_s19 = int_to_ptr.vmem [resolvable:$true] %s19_s19 }
   0x3   :  { %s446_s20 = scalar_lea.vmem %s20_s19, 8192  ;;  %p451_p1 = scmp.lt.s32.totalorder %s20_s19, %s20_s19 }
   0x4   :  { %p447_p0 = scmp.ne.s32.totalorder %s20_s19, %s446_s20  ;;  %p452_p2 = scmp.lt.s32.totalorder %s446_s20, %s446_s20 }
   0x6   :  { %p453_p3 = por %p452_p2, %p451_p1 }
   0x8   :  { %p454_p4 = pnand %p453_p3, %p447_p0 }
   0xa   :  { %457 = shalt.err (!%p454_p4)
}
   0xb   :  { %s483_s21 = smov 256   ;;  %s484_s22 = smov 16  }
   0xc   :  { %25 = dma.hbm_to_vmem [thread:$0]  %s685_s1, 8192, %s20_s19, [#allocation3], %s483_s21, %s483_s21, %s484_s22  }
   0xd   :  { %478 = dma.done.wait [#allocation3], 8192  }
   0xe   :  { %479 = vsyncadd [#allocation3], 4294959104  ;;  %v74_v0 = vld [vmem:[#allocation2 + $0xf8] sm:$0xff]  ;;  %v73_v1 = vld [vmem:[#allocation2 + $0xf0] sm:$0xff]  ;;  %v109_v15 = vlaneseq  ;;  %v485_v16 = vmov 1966171168  }
   0xf   :  { %v72_v2 = vld [vmem:[#allocation2 + $0xe8] sm:$0xff]  ;;  %195 = vmatprep.subr.mxu0 %v74_v0  ;;  %v71_v3 = vld [vmem:[#allocation2 + $0xe0] sm:$0xff]  ;;  %v70_v4 = vld [vmem:[#allocation2 + $0xd8] sm:$0xff]  ;;  %v132_v17 = vunpack.c.l.s4 %v485_v16  ;;  %vm377_vm0 = vcmask 195584  }
  0x10   :  { %196 = vmatpush1.msra.mxu0 %v73_v1  ;;  %v69_v5 = vld [vmem:[#allocation2 + $0xd0] sm:$0xff]  ;;  %v68_v6 = vld [vmem:[#allocation2 + $0xc8] sm:$0xff]  ;;  %v67_v7 = vld [vmem:[#allocation2 + $0xc0] sm:$0xff]  ;;  %v522_v22 = vshrl.u32 %v109_v15, 7 }
  0x11   :  { %197 = vmatprep.subr.mxu0 %v72_v2  ;;  %v66_v8 = vld [vmem:[#allocation2 + $0xb8] sm:$0xff]  ;;  %v65_v9 = vld [vmem:[#allocation2 + $0xb0] sm:$0xff]  ;;  %v64_v10 = vld [vmem:[#allocation2 + $0xa8] sm:$0xff]  ;;  %v133_v23 = vunpack.c.0.s8 %v132_v17 }
  0x12   :  { %198 = vmatpush1.msra.mxu0 %v71_v3  ;;  %v63_v11 = vld [vmem:[#allocation2 + $0xa0] sm:$0xff]  ;;  %v62_v12 = vld [vmem:[#allocation2 + $0x98] sm:$0xff]  ;;  %v61_v13 = vld [vmem:[#allocation2 + $0x90] sm:$0xff] }
  0x13   :  { %199 = vmatprep.subr.mxu0 %v70_v4  ;;  %v60_v14 = vld [vmem:[#allocation2 + $0x88] sm:$0xff]  ;;  %v59_v18 = vld [vmem:[#allocation2 + $0x80] sm:$0xff]  ;;  %v58_v19 = vld [vmem:[#allocation2 + $0x78] sm:$0xff]  ;;  %v525_v30 = vsub.s32 %v133_v23, %v522_v22 }
  0x14   :  { %200 = vmatpush1.msra.mxu0 %v69_v5  ;;  %v57_v20 = vld [vmem:[#allocation2 + $0x70] sm:$0xff]  ;;  %v56_v21 = vld [vmem:[#allocation2 + $0x68] sm:$0xff]  ;;  %v55_v24 = vld [vmem:[#allocation2 + $0x60] sm:$0xff] }
  0x15   :  { %201 = vmatprep.subr.mxu0 %v68_v6  ;;  %v54_v25 = vld [vmem:[#allocation2 + $0x58] sm:$0xff]  ;;  %v53_v26 = vld [vmem:[#allocation2 + $0x50] sm:$0xff]  ;;  %v52_v27 = vld [vmem:[#allocation2 + $0x48] sm:$0xff] }
  0x16   :  { %202 = vmatpush1.msra.mxu0 %v67_v7  ;;  %v51_v28 = vld [vmem:[#allocation2 + $0x40] sm:$0xff]  ;;  %v50_v29 = vld [vmem:[#allocation2 + $0x38] sm:$0xff]  ;;  %v49_v31 = vld [vmem:[#allocation2 + $0x30] sm:$0xff] }
  0x17   :  { %203 = vmatprep.subr.mxu0 %v66_v8  ;;  %v35_v32 = vld [vmem:[%s684_s0] sm:$0x3]  ;;  %v36_v33 = vld [vmem:[%s684_s0 + $0x2] sm:$0x3]  ;;  %v48_v34 = vld [vmem:[#allocation2 + $0x28] sm:$0xff] }
  0x18   :  { %204 = vmatpush1.msra.mxu0 %v65_v9  ;;  %v37_v35 = vld [vmem:[%s684_s0 + $0x4] sm:$0x3]  ;;  %v38_v36 = vld [vmem:[%s684_s0 + $0x6] sm:$0x3]  ;;  %v39_v37 = vld [vmem:[%s684_s0 + $0x8] sm:$0x3]  ;;  %v127_v38 = vcombine.low %v35_v32, %v36_v33 }
  0x19   :  { %205 = vmatprep.subr.mxu0 %v64_v10  ;;  %v40_v39 = vld [vmem:[%s684_s0 + $0xa] sm:$0x3]  ;;  %v41_v40 = vld [vmem:[%s684_s0 + $0xc] sm:$0x3]  ;;  %v42_v41 = vld [vmem:[%s684_s0 + $0xe] sm:$0x3]  ;;  %v128_v42 = vcombine.low %v37_v35, %v38_v36 }
  0x1a   :  { %206 = vmatpush1.msra.mxu0 %v63_v11  ;;  %v129_v43 = vcombine.low %v39_v37, %v40_v39  ;;  %v130_v44 = vcombine.low %v41_v40, %v42_v41  ;;  %v552_v45 = vrot.slane %v127_v38, %v525_v30  ;;  %v299_v46 = vld [vmem:[%s687_s3 + $0xf8] sm:$0xff]  ;;  %v298_v48 = vld [vmem:[%s687_s3 + $0xf0] sm:$0xff]  ;;  %v47_v49 = vld [vmem:[#allocation2 + $0x20] sm:$0xff] }
  0x1b   :  { %207 = vmatprep.subr.mxu0 %v62_v12  ;;  %v283_v47 = vld [vmem:[%s687_s3 + $0x78] sm:$0xff]  ;;  %v564_v50 = vrot.slane %v128_v42, %v525_v30  ;;  %397 = vmatprep.subr.mxu1 %v299_v46  ;;  %v282_v51 = vld [vmem:[%s687_s3 + $0x70] sm:$0xff]  ;;  %v297_v55 = vld [vmem:[%s687_s3 + $0xe8] sm:$0xff] }
  0x1c   :  { %208 = vmatpush1.msra.mxu0 %v61_v13  ;;  %v46_v52 = vld [vmem:[#allocation2 + $0x18] sm:$0xff]  ;;  %v570_v53 = vrot.slane %v129_v43, %v525_v30  ;;  %v573_v54 = vrot.slane %v130_v44, %v525_v30  ;;  %398 = vmatpush3.msra.mxu1 %v283_v47  ;;  %v45_v56 = vld [vmem:[#allocation2 + $0x10] sm:$0xff]  ;;  %v281_v58 = vld [vmem:[%s687_s3 + $0x68] sm:$0xff] }
  0x1d   :  { %209 = vmatprep.subr.mxu0 %v60_v14  ;;  %v160_v57 = vcombine.high %v552_v45, %v564_v50  ;;  %399 = vmatprep.subr.mxu1 %v298_v48  ;;  %v44_v59 = vld [vmem:[#allocation2 + $0x8] sm:$0xff]  ;;  %v296_v61 = vld [vmem:[%s687_s3 + $0xe0] sm:$0xff]  ;;  %v106_v1 = vld [vmem:[#allocation2 + $0x1f8] sm:$0xff]  ;;  %v159_v46 = vcombine.low %v552_v45, %v564_v50 }
  0x1e   :  { %210 = vmatpush1.msra.mxu0 %v59_v18  ;;  %v162_v60 = vcombine.high %v570_v53, %v573_v54  ;;  %400 = vmatpush3.msra.mxu1 %v282_v51  ;;  %v43_v62 = vld [vmem:[#allocation2] sm:$0xff]  ;;  %v295_v3 = vld [vmem:[%s687_s3 + $0xd8] sm:$0xff]  ;;  %v105_v4 = vld [vmem:[#allocation2 + $0x1f0] sm:$0xff]  ;;  %v161_v47 = vcombine.low %v570_v53, %v573_v54 }
  0x1f   :  { %211 = vmatprep.subr.mxu0 %v58_v19  ;;  %v176_v63 = vrot.slane %v160_v57, %v525_v30  ;;  %401 = vmatprep.subr.mxu1 %v297_v55  ;;  %v280_v0 = vld [vmem:[%s687_s3 + $0x60] sm:$0xff]  ;;  %v104_v5 = vld [vmem:[#allocation2 + $0x1e8] sm:$0xff]  ;;  %v279_v7 = vld [vmem:[%s687_s3 + $0x58] sm:$0xff]  ;;  %v169_v55 = vrot.slane %v159_v46, %v525_v30 }
  0x20   :  { %212 = vmatpush1.msra.mxu0 %v57_v20  ;;  %v190_v2 = vrot.slane %v162_v60, %v525_v30  ;;  %402 = vmatpush3.msra.mxu1 %v281_v58  ;;  %v103_v8 = vld [vmem:[#allocation2 + $0x1e0] sm:$0xff]  ;;  %v294_v9 = vld [vmem:[%s687_s3 + $0xd0] sm:$0xff]  ;;  %v102_v10 = vld [vmem:[#allocation2 + $0x1d8] sm:$0xff] }
  0x21   :  { %213 = vmatprep.subr.mxu0 %v56_v21  ;;  %403 = vmatprep.subr.mxu1 %v296_v61  ;;  %v278_v11 = vld [vmem:[%s687_s3 + $0x50] sm:$0xff]  ;;  %v293_v13 = vld [vmem:[%s687_s3 + $0xc8] sm:$0xff]  ;;  %v99_v16 = vld [vmem:[#allocation2 + $0x1c0] sm:$0xff] }
  0x22   :  { %214 = vmatpush1.msra.mxu0 %v55_v24  ;;  %v192_v6 = vcombine.low %v176_v63, %v190_v2  ;;  %404 = vmatpush3.msra.mxu1 %v280_v0  ;;  %v101_v12 = vld [vmem:[#allocation2 + $0x1d0] sm:$0xff]  ;;  %v100_v14 = vld [vmem:[#allocation2 + $0x1c8] sm:$0xff]  ;;  %v292_v17 = vld [vmem:[%s687_s3 + $0xc0] sm:$0xff] }
  0x23   :  { %215 = vmatprep.subr.mxu0 %v54_v25  ;;  %405 = vmatprep.subr.mxu1 %v295_v3  ;;  %v277_v15 = vld [vmem:[%s687_s3 + $0x48] sm:$0xff]  ;;  %v98_v18 = vld [vmem:[#allocation2 + $0x1b8] sm:$0xff]  ;;  %v276_v19 = vld [vmem:[%s687_s3 + $0x40] sm:$0xff]  ;;  %v115_v3 = vsub.s32 1, %v522_v22 }
  0x24   :  { %216 = vmatpush1.msra.mxu0 %v53_v26  ;;  %259 = vmatprep.mubr.f32.mxu0 %v192_v6  ;;  %v97_v20 = vld [vmem:[#allocation2 + $0x1b0] sm:$0xff]  ;;  %v291_v21 = vld [vmem:[%s687_s3 + $0xb8] sm:$0xff]  ;;  %v96_v23 = vld [vmem:[#allocation2 + $0x1a8] sm:$0xff] }
  0x25   :  { %217 = vmatprep.subr.mxu0 %v52_v27  ;;  %406 = vmatpush3.msra.mxu1 %v279_v7  ;;  %v275_v24 = vld [vmem:[%s687_s3 + $0x38] sm:$0xff]  ;;  %v95_v25 = vld [vmem:[#allocation2 + $0x1a0] sm:$0xff]  ;;  %v290_v26 = vld [vmem:[%s687_s3 + $0xb0] sm:$0xff] }
  0x26   :  { %218 = vmatpush1.msra.mxu0 %v51_v28  ;;  %407 = vmatprep.subr.mxu1 %v294_v9  ;;  %v94_v27 = vld [vmem:[#allocation2 + $0x198] sm:$0xff]  ;;  %v274_v28 = vld [vmem:[%s687_s3 + $0x30] sm:$0xff]  ;;  %v92_v32 = vld [vmem:[#allocation2 + $0x188] sm:$0xff] }
  0x27   :  { %219 = vmatprep.subr.mxu0 %v50_v29  ;;  %408 = vmatpush3.msra.mxu1 %v278_v11  ;;  %v93_v29 = vld [vmem:[#allocation2 + $0x190] sm:$0xff]  ;;  %v273_v33 = vld [vmem:[%s687_s3 + $0x28] sm:$0xff]  ;;  %v288_v35 = vld [vmem:[%s687_s3 + $0xa0] sm:$0xff] }
  0x28   :  { %220 = vmatpush1.msra.mxu0 %v49_v31  ;;  %409 = vmatprep.subr.mxu1 %v293_v13  ;;  %v289_v31 = vld [vmem:[%s687_s3 + $0xa8] sm:$0xff]  ;;  %v90_v36 = vld [vmem:[#allocation2 + $0x178] sm:$0xff]  ;;  %v272_v37 = vld [vmem:[%s687_s3 + $0x20] sm:$0xff] }
  0x29   :  { %221 = vmatprep.subr.mxu0 %v48_v34  ;;  %410 = vmatpush3.msra.mxu1 %v277_v15  ;;  %v91_v34 = vld [vmem:[#allocation2 + $0x180] sm:$0xff]  ;;  %v89_v38 = vld [vmem:[#allocation2 + $0x170] sm:$0xff]  ;;  %v88_v39 = vld [vmem:[#allocation2 + $0x168] sm:$0xff] }
  0x2a   :  { %222 = vmatpush1.msra.mxu0 %v47_v49  ;;  %411 = vmatprep.subr.mxu1 %v292_v17  ;;  %v87_v40 = vld [vmem:[#allocation2 + $0x160] sm:$0xff]  ;;  %v86_v41 = vld [vmem:[#allocation2 + $0x158] sm:$0xff]  ;;  %v85_v42 = vld [vmem:[#allocation2 + $0x150] sm:$0xff] }
  0x2b   :  { %223 = vmatprep.subr.mxu0 %v46_v52  ;;  %412 = vmatpush3.msra.mxu1 %v276_v19  ;;  %v84_v43 = vld [vmem:[#allocation2 + $0x148] sm:$0xff]  ;;  %v83_v44 = vld [vmem:[#allocation2 + $0x140] sm:$0xff]  ;;  %v82_v48 = vld [vmem:[#allocation2 + $0x138] sm:$0xff] }
  0x2c   :  { %224 = vmatpush1.msra.mxu0 %v45_v56  ;;  %413 = vmatprep.subr.mxu1 %v291_v21  ;;  %v81_v49 = vld [vmem:[#allocation2 + $0x130] sm:$0xff]  ;;  %v80_v51 = vld [vmem:[#allocation2 + $0x128] sm:$0xff]  ;;  %v79_v52 = vld [vmem:[#allocation2 + $0x120] sm:$0xff]  ;;  %v183_v56 = vrot.slane %v161_v47, %v525_v30 }
  0x2d   :  { %225 = vmatprep.subr.mxu0 %v44_v59  ;;  %414 = vmatpush3.msra.mxu1 %v275_v24  ;;  %v78_v57 = vld [vmem:[#allocation2 + $0x118] sm:$0xff]  ;;  %v77_v58 = vld [vmem:[#allocation2 + $0x110] sm:$0xff]  ;;  %v76_v45 = vld [vmem:[#allocation2 + $0x108] sm:$0xff] }
  0x2e   :  { %226 = vmatpush1.msra.mxu0 %v43_v62  ;;  %415 = vmatprep.subr.mxu1 %v290_v26  ;;  %v75_v50 = vld [vmem:[#allocation2 + $0x100] sm:$0xff]  ;;  %v191_v53 = vcombine.low %v169_v55, %v183_v56  ;;  %v287_v54 = vld [vmem:[%s687_s3 + $0x98] sm:$0xff]  ;;  %v286_v59 = vld [vmem:[%s687_s3 + $0x90] sm:$0xff] }
  0x2f   :  { %227 = vmatprep.subr.mxu0 %v106_v1  ;;  %416 = vmatpush3.msra.mxu1 %v274_v28  ;;  %v271_v30 = vld [vmem:[%s687_s3 + $0x18] sm:$0xff]  ;;  %v270_v60 = vld [vmem:[%s687_s3 + $0x10] sm:$0xff]  ;;  %v285_v61 = vld [vmem:[%s687_s3 + $0x88] sm:$0xff]  ;;  %v111_v1 = vsub.s32 0, %v522_v22 }
  0x30   :  { %228 = vmatpush2.msra.mxu0 %v105_v4  ;;  %417 = vmatprep.subr.mxu1 %v289_v31  ;;  %v269_v62 = vld [vmem:[%s687_s3 + $0x8] sm:$0xff]  ;;  %v284_v63 = vld [vmem:[%s687_s3 + $0x80] sm:$0xff] }
  0x31   :  { %229 = vmatprep.subr.mxu0 %v104_v5  ;;  %418 = vmatpush3.msra.mxu1 %v273_v33  ;;  %v268_v0 = vld [vmem:[%s687_s3] sm:$0xff] }
  0x32   :  { %230 = vmatpush2.msra.mxu0 %v103_v8  ;;  %419 = vmatprep.subr.mxu1 %v288_v35  ;;  %v107_v2 = vld [vmem:[%s686_s2] sm:$0x3] }
  0x33   :  { %231 = vmatprep.subr.mxu0 %v102_v10  ;;  %420 = vmatpush3.msra.mxu1 %v272_v37  ;;  %v112_v4 = vrot.slane %v107_v2, %v111_v1  ;;  %v116_v5 = vrot.slane %v107_v2, %v115_v3  ;;  %v396_v13 = vld [vmem:[%s688_s4] ss:$0 sm:$0xff] }
  0x34   :  { %232 = vmatpush2.msra.mxu0 %v101_v12  ;;  %421 = vmatprep.subr.mxu1 %v287_v54 }
  0x35   :  { %233 = vmatprep.subr.mxu0 %v100_v14  ;;  %422 = vmatpush3.msra.mxu1 %v271_v30 }
  0x36   :  { %234 = vmatpush2.msra.mxu0 %v99_v16  ;;  %423 = vmatprep.subr.mxu1 %v286_v59 }
  0x37   :  { %235 = vmatprep.subr.mxu0 %v98_v18  ;;  %424 = vmatpush3.msra.mxu1 %v270_v60 }
  0x38   :  { %236 = vmatpush2.msra.mxu0 %v97_v20  ;;  %425 = vmatprep.subr.mxu1 %v285_v61 }
  0x39   :  { %237 = vmatprep.subr.mxu0 %v96_v23  ;;  %426 = vmatpush3.msra.mxu1 %v269_v62 }
  0x3a   :  { %238 = vmatpush2.msra.mxu0 %v95_v25  ;;  %427 = vmatprep.subr.mxu1 %v284_v63 }
  0x3b   :  { %239 = vmatprep.subr.mxu0 %v94_v27  ;;  %428 = vmatpush3.msra.mxu1 %v268_v0 }
  0x3c   :  { %240 = vmatpush2.msra.mxu0 %v93_v29 }
  0x3d   :  { %241 = vmatprep.subr.mxu0 %v92_v32 }
  0x3e   :  { %242 = vmatpush2.msra.mxu0 %v91_v34 }
  0x3f   :  { %243 = vmatprep.subr.mxu0 %v90_v36 }
  0x40   :  { %244 = vmatpush2.msra.mxu0 %v89_v38 }
  0x41   :  { %245 = vmatprep.subr.mxu0 %v88_v39 }
  0x42   :  { %246 = vmatpush2.msra.mxu0 %v87_v40 }
  0x43   :  { %247 = vmatprep.subr.mxu0 %v86_v41 }
  0x44   :  { %248 = vmatpush2.msra.mxu0 %v85_v42 }
  0x45   :  { %249 = vmatprep.subr.mxu0 %v84_v43 }
  0x46   :  { %250 = vmatpush2.msra.mxu0 %v83_v44 }
  0x47   :  { %251 = vmatprep.subr.mxu0 %v82_v48 }
  0x48   :  { %252 = vmatpush2.msra.mxu0 %v81_v49 }
  0x49   :  { %253 = vmatprep.subr.mxu0 %v80_v51 }
  0x4a   :  { %254 = vmatpush2.msra.mxu0 %v79_v52 }
  0x4b   :  { %255 = vmatprep.subr.mxu0 %v78_v57 }
  0x4c   :  { %256 = vmatpush2.msra.mxu0 %v77_v58 }
  0x4d   :  { %257 = vmatprep.subr.mxu0 %v76_v45 }
  0x4e   :  { %258 = vmatpush2.msra.mxu0 %v75_v50 }
  0x4f   :  { %260 = vmatmul.mubr.f32.vlgmr.msra.gmra.mxu0 %v191_v53 }
 0x10f   :  { %v261_v6 = vpop.f32.mrf.mxu0 }
 0x110   :  { %v262_v7 = vadd.f32 %v261_v6, %v112_v4 }
 0x111   :  { %v263_v8 = vpop.f32.mrf.mxu0 }
 0x112   :  { %v264_v9 = vadd.f32 %v263_v8, %v116_v5  ;;  %v266_v11 = vmax.f32 %v262_v7, 0.0 }
 0x114   :  { %v267_v10 = vmax.f32 %v264_v9, 0.0 }
 0x116   :  { %371 = vmatprep.mubr.f32.mxu1 %v267_v10 }
 0x117   :  { %372 = vmatmul.mubr.f32.vlgmr.msra.gmra.mxu1 %v266_v11 }
 0x1d7   :  { %v429_v12 = vpop.f32.mrf.mxu1 }
 0x1d9   :  { %v430_v14 = vpop.f32.mrf.mxu1 }
 0x1da   :  { %v431_v15 = vadd.f32 %v430_v14, %v429_v12 }
 0x1dc   :  { %v374_v16 = vadd.f32 %v431_v15, %v396_v13 }
 0x1de   :  { %378 = vst.msk [vmem:[#allocation5] sm:$0xff] %vm377_vm0, %v374_v16 }
 0x1df   :  { %383 = vsyncadd [#allocation4], 112  ;;  %s486_s2 = smov [#allocation5]  }
 0x1e0   :  { %s384_s29 = sshll.u32 %s486_s2, 4  ;;  %s385_s29 = int_to_ptr.vmem [resolvable:$true] %s384_s29 }
 0x1e1   :  { %s458_s30 = scalar_lea.vmem %s385_s29, 16  ;;  %s462_s6 = scalar_lea.vmem %s385_s29, 128 }
 0x1e2   :  { %p459_p5 = scmp.ne.s32.totalorder %s385_s29, %s458_s30  ;;  %p463_p6 = scmp.lt.s32.totalorder %s385_s29, %s385_s29 }
 0x1e3   :  { %p464_p7 = scmp.lt.s32.totalorder %s462_s6, %s458_s30 }
 0x1e5   :  { %p465_p8 = por %p464_p7, %p463_p6 }
 0x1e7   :  { %p466_p9 = pnand %p465_p8, %p459_p5 }
 0x1e9   :  { %469 = shalt.err (!%p466_p9)
}
 0x1ea   :  { %s487_s7 = smov 1  }
 0x1eb   :  { %390 = dma.vmem_to_hbm [thread:$0]  %s385_s29, 16, %s689_s5, [#allocation4], %s484_s22, %s484_s22, %s487_s7  }
 0x1ec   :  { %480 = dma.done.wait [#allocation4], 128  }
 0x1ed   :  { %481 = vsyncadd [#allocation4], 4294967168 }
 0x1ee   :  { %394 = vsyncpa [#allocation3], 1 }
 0x1ef   :  { %395 = vsyncpa [#allocation4], 1 }

</bundles_post_ra>
